<compile_context>
chip_gen: v5e
topology: v5e:2x2
jax: 0.10.0
libtpu: 0.0.40
codegen_flags: <defaults>
</compile_context>

<pallas_src>
import jax
import jax.numpy as jnp
from jax.experimental import pallas as pl
from jax.experimental.pallas import tpu as pltpu

_PRECISION = jax.lax.Precision.HIGHEST


def _mlp_kernel(xt_ref, w1t_ref, b1c_ref, w2t_ref, b2c_ref, w3t_ref, b3c_ref,
                out_ref):
    xt = xt_ref[...]                                              # (C, tb)
    h1 = jnp.dot(w1t_ref[...], xt,
                 preferred_element_type=jnp.float32,
                 precision=_PRECISION)                            # (32, tb)
    h1 = jnp.maximum(h1 + b1c_ref[...], 0.0)
    h2 = jnp.dot(w2t_ref[...], h1,
                 preferred_element_type=jnp.float32,
                 precision=_PRECISION)                            # (16, tb)
    h2 = jnp.maximum(h2 + b2c_ref[...], 0.0)
    h3 = jnp.dot(w3t_ref[...], h2,
                 preferred_element_type=jnp.float32,
                 precision=_PRECISION)                            # (O, tb)
    out_ref[...] = (h3 + b3c_ref[...]).astype(out_ref.dtype)


def _choose_tile_b(B):
    # Large tiles (multiple of 128) with a small grid (2-8 steps) to amortize
    # the ~0.35 us per-step overhead; prefer an EVEN grid so v7x's two
    # TensorCores split the "parallel" axis evenly.  Single-tile fallback for
    # small or awkward batch sizes.
    best = None
    for cand in (16384, 8192, 4096, 2048, 1024, 512, 256, 128):
        if cand >= B or B % cand != 0:
            continue
        g = B // cand
        if g >= 2:
            if best is None:
                best = cand          # largest tile with grid >= 2
            if g % 2 == 0:
                return cand          # first (largest) tile giving an even grid
    return best if best is not None else B


def conditional_base_forward(condition, params, *, tile_b=None):
    """condition: (B, condition_dim) float32. Returns (mean, log_std), each (B, latent_dim)."""
    w1, b1, w2, b2, w3, b3 = params
    B, C = condition.shape
    H1 = w1.shape[1]          # 32
    H2 = w2.shape[1]          # 16
    O = w3.shape[1]           # 2 * latent_dim

    tb = tile_b if tile_b is not None else _choose_tile_b(B)
    assert B % tb == 0, "tile_b must divide the batch"
    assert tb == B or tb % 128 == 0, (
        "tile_b must be a multiple of 128 (lane-dense tiles) or equal B")

    # Batch-on-lanes layout: transposed input, (out, in) weights, column biases.
    cond_t = condition.T            # (C, B) — single XLA layout pass
    w1t = w1.T                      # (H1, C)
    w2t = w2.T                      # (H2, H1)
    w3t = w3.T                      # (O, H2)
    b1c = b1.reshape(H1, 1)
    b2c = b2.reshape(H2, 1)
    b3c = b3.reshape(O, 1)

    grid = (B // tb,)
    out_t = pl.pallas_call(
        _mlp_kernel,
        out_shape=jax.ShapeDtypeStruct((O, B), condition.dtype),
        grid_spec=pl.GridSpec(
            grid=grid,
            in_specs=[
                pl.BlockSpec((C, tb), lambda i: (0, i)),       # condition^T tile
                pl.BlockSpec((H1, C), lambda i: (0, 0)),       # W1^T (resident)
                pl.BlockSpec((H1, 1), lambda i: (0, 0)),       # b1 column
                pl.BlockSpec((H2, H1), lambda i: (0, 0)),      # W2^T
                pl.BlockSpec((H2, 1), lambda i: (0, 0)),       # b2 column
                pl.BlockSpec((O, H2), lambda i: (0, 0)),       # W3^T
                pl.BlockSpec((O, 1), lambda i: (0, 0)),        # b3 column
            ],
            out_specs=pl.BlockSpec((O, tb), lambda i: (0, i)),  # lane-dense output
        ),
        compiler_params=pltpu.CompilerParams(
            dimension_semantics=("parallel",)),
    )(cond_t, w1t, b1c, w2t, b2c, w3t, b3c)

    # Single layout pass back to (B, O), then cheap column slices.
    out_bt = out_t.T                     # (B, O)
    latent_dim = O // 2
    mean = out_bt[:, :latent_dim]        # (B, latent_dim)
    log_std = out_bt[:, latent_dim:]     # (B, latent_dim)
    return mean, log_std


def init_params(key, condition_dim, latent_dim):
    """Deterministic init mimicking nn.Linear default (uniform(-1/sqrt(fan_in), +))."""
    dims = [(condition_dim, 32), (32, 16), (16, 2 * latent_dim)]
    params = []
    for (fan_in, fan_out) in dims:
        key, kw, kb = jax.random.split(key, 3)
        bound = 1.0 / jnp.sqrt(fan_in)
        w = jax.random.uniform(kw, (fan_in, fan_out), jnp.float32, -bound, bound)
        b = jax.random.uniform(kb, (fan_out,), jnp.float32, -bound, bound)
        params.extend([w, b])
    return tuple(params)


def _reference(condition, params):
    w1, b1, w2, b2, w3, b3 = params
    h = jnp.maximum(condition @ w1 + b1, 0.0)
    h = jnp.maximum(h @ w2 + b2, 0.0)
    out = h @ w3 + b3
    L = out.shape[1] // 2
    return out[:, :L], out[:, L:]


if __name__ == "__main__":
    key = jax.random.PRNGKey(0)
    condition_dim = 4
    latent_dim = 4

    kparam, kx1, kx2 = jax.random.split(key, 3)
    params = init_params(kparam, condition_dim, latent_dim)

    # Small case (grid = 1, tile == batch).
    batch = 8
    condition = jax.random.normal(kx1, (batch, condition_dim), jnp.float32)
    mean, log_std = conditional_base_forward(condition, params)
    mean = jax.block_until_ready(mean)
    log_std = jax.block_until_ready(log_std)
    mean_ref, log_std_ref = _reference(condition, params)
    assert mean.shape == (batch, latent_dim)
    assert log_std.shape == (batch, latent_dim)
    assert jnp.allclose(mean, mean_ref, atol=1e-5, rtol=1e-5)
    assert jnp.allclose(log_std, log_std_ref, atol=1e-5, rtol=1e-5)

    # Tiled case (grid = 2, lane-dense 128-row tiles) to exercise the pipeline
    # and the even-grid (dual-TC) path.
    batch2 = 256
    condition2 = jax.random.normal(kx2, (batch2, condition_dim), jnp.float32)
    mean2, log_std2 = conditional_base_forward(condition2, params)
    mean2 = jax.block_until_ready(mean2)
    log_std2 = jax.block_until_ready(log_std2)
    mean2_ref, log_std2_ref = _reference(condition2, params)
    assert jnp.allclose(mean2, mean2_ref, atol=1e-5, rtol=1e-5)
    assert jnp.allclose(log_std2, log_std2_ref, atol=1e-5, rtol=1e-5)

    print("KERNEL_OK")
</pallas_src>

<mosaic_0001>
module attributes {stable_mosaic.version = 11 : i64} {
  func.func @_mlp_kernel(%arg0: i32, %arg1: memref<4x8xf32, #tpu.memory_space<vmem>>, %arg2: memref<32x4xf32, #tpu.memory_space<vmem>>, %arg3: memref<32x1xf32, #tpu.memory_space<vmem>>, %arg4: memref<16x32xf32, #tpu.memory_space<vmem>>, %arg5: memref<16x1xf32, #tpu.memory_space<vmem>>, %arg6: memref<8x16xf32, #tpu.memory_space<vmem>>, %arg7: memref<8x1xf32, #tpu.memory_space<vmem>>, %arg8: memref<8x8xf32, #tpu.memory_space<vmem>>) attributes {dimension_semantics = [#tpu.dimension_semantics<parallel>], iteration_bounds = array<i64: 1>, scalar_prefetch = 0 : i64, scratch_operands = 0 : i64, tpu.core_type = #tpu.core_type<tc>, window_params = [{transform_indices = @transform_0, window_bounds = array<i64: 4, 8>}, {pipeline_mode = #tpu.pipeline_mode<synchronous>, transform_indices = @transform_1, window_bounds = array<i64: 32, 4>}, {pipeline_mode = #tpu.pipeline_mode<synchronous>, transform_indices = @transform_2, window_bounds = array<i64: 32, 1>}, {pipeline_mode = #tpu.pipeline_mode<synchronous>, transform_indices = @transform_3, window_bounds = array<i64: 16, 32>}, {pipeline_mode = #tpu.pipeline_mode<synchronous>, transform_indices = @transform_4, window_bounds = array<i64: 16, 1>}, {pipeline_mode = #tpu.pipeline_mode<synchronous>, transform_indices = @transform_5, window_bounds = array<i64: 8, 16>}, {pipeline_mode = #tpu.pipeline_mode<synchronous>, transform_indices = @transform_6, window_bounds = array<i64: 8, 1>}, {transform_indices = @transform_7, window_bounds = array<i64: 8, 8>}]} {
    %c0 = arith.constant 0 : index
    %c0_0 = arith.constant 0 : index
    %0 = vector.load %arg1[%c0, %c0_0] : memref<4x8xf32, #tpu.memory_space<vmem>>, vector<4x8xf32>
    %c0_1 = arith.constant 0 : index
    %c0_2 = arith.constant 0 : index
    %1 = vector.load %arg2[%c0_1, %c0_2] : memref<32x4xf32, #tpu.memory_space<vmem>>, vector<32x4xf32>
    %cst = arith.constant dense<0.000000e+00> : vector<32x8xf32>
    %2 = tpu.matmul %1, %0, %cst {dimension_numbers = #tpu.dot_dimension_numbers<[1], [0], [0], [1], [0, 0, 1, 1], [], []>, precision = #tpu.contract_precision<fp32>} : vector<32x4xf32>, vector<4x8xf32>, vector<32x8xf32> -> vector<32x8xf32>
    %c0_3 = arith.constant 0 : index
    %c0_4 = arith.constant 0 : index
    %3 = vector.load %arg3[%c0_3, %c0_4] : memref<32x1xf32, #tpu.memory_space<vmem>>, vector<32x1xf32>
    %4 = vector.broadcast %3 : vector<32x1xf32> to vector<32x8xf32>
    %5 = arith.addf %2, %4 : vector<32x8xf32>
    %cst_5 = arith.constant 0.000000e+00 : f32
    %6 = vector.broadcast %cst_5 : f32 to vector<32x8xf32>
    %7 = arith.maximumf %5, %6 : vector<32x8xf32>
    %c0_6 = arith.constant 0 : index
    %c0_7 = arith.constant 0 : index
    %8 = vector.load %arg4[%c0_6, %c0_7] : memref<16x32xf32, #tpu.memory_space<vmem>>, vector<16x32xf32>
    %cst_8 = arith.constant dense<0.000000e+00> : vector<16x8xf32>
    %9 = tpu.matmul %8, %7, %cst_8 {dimension_numbers = #tpu.dot_dimension_numbers<[1], [0], [0], [1], [0, 0, 1, 1], [], []>, precision = #tpu.contract_precision<fp32>} : vector<16x32xf32>, vector<32x8xf32>, vector<16x8xf32> -> vector<16x8xf32>
    %c0_9 = arith.constant 0 : index
    %c0_10 = arith.constant 0 : index
    %10 = vector.load %arg5[%c0_9, %c0_10] : memref<16x1xf32, #tpu.memory_space<vmem>>, vector<16x1xf32>
    %11 = vector.broadcast %10 : vector<16x1xf32> to vector<16x8xf32>
    %12 = arith.addf %9, %11 : vector<16x8xf32>
    %cst_11 = arith.constant 0.000000e+00 : f32
    %13 = vector.broadcast %cst_11 : f32 to vector<16x8xf32>
    %14 = arith.maximumf %12, %13 : vector<16x8xf32>
    %c0_12 = arith.constant 0 : index
    %c0_13 = arith.constant 0 : index
    %15 = vector.load %arg6[%c0_12, %c0_13] : memref<8x16xf32, #tpu.memory_space<vmem>>, vector<8x16xf32>
    %cst_14 = arith.constant dense<0.000000e+00> : vector<8x8xf32>
    %16 = tpu.matmul %15, %14, %cst_14 {dimension_numbers = #tpu.dot_dimension_numbers<[1], [0], [0], [1], [0, 0, 1, 1], [], []>, precision = #tpu.contract_precision<fp32>} : vector<8x16xf32>, vector<16x8xf32>, vector<8x8xf32> -> vector<8x8xf32>
    %c0_15 = arith.constant 0 : index
    %c0_16 = arith.constant 0 : index
    %17 = vector.load %arg7[%c0_15, %c0_16] : memref<8x1xf32, #tpu.memory_space<vmem>>, vector<8x1xf32>
    %18 = vector.broadcast %17 : vector<8x1xf32> to vector<8x8xf32>
    %19 = arith.addf %16, %18 : vector<8x8xf32>
    %c0_17 = arith.constant 0 : index
    %c0_18 = arith.constant 0 : index
    %20 = vector.load %arg8[%c0_17, %c0_18] : memref<8x8xf32, #tpu.memory_space<vmem>>, vector<8x8xf32>
    tpu.vector_store %arg8[%c0_17, %c0_18], %19 {strides = array<i32>} : memref<8x8xf32, #tpu.memory_space<vmem>>, vector<8x8xf32>,
    return
  }
  func.func @transform_0(%arg0: i32) -> (i32, i32) {
    %c0_i32 = arith.constant 0 : i32
    %c0_i32_0 = arith.constant 0 : i32
    return %c0_i32, %arg0 : i32, i32
  }
  func.func @transform_1(%arg0: i32) -> (i32, i32) {
    %c0_i32 = arith.constant 0 : i32
    %c0_i32_0 = arith.constant 0 : i32
    %c0_i32_1 = arith.constant 0 : i32
    return %c0_i32, %c0_i32_0 : i32, i32
  }
  func.func @transform_2(%arg0: i32) -> (i32, i32) {
    %c0_i32 = arith.constant 0 : i32
    %c0_i32_0 = arith.constant 0 : i32
    %c0_i32_1 = arith.constant 0 : i32
    return %c0_i32, %c0_i32_0 : i32, i32
  }
  func.func @transform_3(%arg0: i32) -> (i32, i32) {
    %c0_i32 = arith.constant 0 : i32
    %c0_i32_0 = arith.constant 0 : i32
    %c0_i32_1 = arith.constant 0 : i32
    return %c0_i32, %c0_i32_0 : i32, i32
  }
  func.func @transform_4(%arg0: i32) -> (i32, i32) {
    %c0_i32 = arith.constant 0 : i32
    %c0_i32_0 = arith.constant 0 : i32
    %c0_i32_1 = arith.constant 0 : i32
    return %c0_i32, %c0_i32_0 : i32, i32
  }
  func.func @transform_5(%arg0: i32) -> (i32, i32) {
    %c0_i32 = arith.constant 0 : i32
    %c0_i32_0 = arith.constant 0 : i32
    %c0_i32_1 = arith.constant 0 : i32
    return %c0_i32, %c0_i32_0 : i32, i32
  }
  func.func @transform_6(%arg0: i32) -> (i32, i32) {
    %c0_i32 = arith.constant 0 : i32
    %c0_i32_0 = arith.constant 0 : i32
    %c0_i32_1 = arith.constant 0 : i32
    return %c0_i32, %c0_i32_0 : i32, i32
  }
  func.func @transform_7(%arg0: i32) -> (i32, i32) {
    %c0_i32 = arith.constant 0 : i32
    %c0_i32_0 = arith.constant 0 : i32
    return %c0_i32, %arg0 : i32, i32
  }
}

</mosaic_0001>

<bundles_post_ra>
// kernel: tpu_custom_call.1
= control target key start
LH: loop header
LB: loop body
LE: loop exit
PB: predicated region body
PF: predicated region fallthrough
CT: control target
= control target key end

     0   :  { %vm69_vm0 = vcmask 1043456   ;;  %vm56_vm1 = vcmask 31744   ;;  %v774_v4 = vmov 0   ;;  %s875_s0 = inlined_call_operand.vmem [shape: f32[4,8], index: 0, kind: input, shape index: {}]   ;;  %s876_s1 = inlined_call_operand.vmem [shape: f32[32,4], index: 1, kind: input, shape index: {}]   ;;  %s877_s2 = inlined_call_operand.vmem [shape: f32[32,1], index: 2, kind: input, shape index: {}]   ;;  %s878_s3 = inlined_call_operand.vmem [shape: f32[16,32], index: 3, kind: input, shape index: {}]   ;;  %s879_s4 = inlined_call_operand.vmem [shape: f32[16,1], index: 4, kind: input, shape index: {}]   ;;  %s880_s5 = inlined_call_operand.vmem [shape: f32[8,16], index: 5, kind: input, shape index: {}]   ;;  %s881_s6 = inlined_call_operand.vmem [shape: f32[8,1], index: 6, kind: input, shape index: {}]   ;;  %s882_s7 = inlined_call_operand.hbm [shape: f32[8,8], index: 7, kind: output, shape index: {}]  }
   0x1   :  { %v27_v0 = vld [vmem:[%s875_s0] sm:$0xf]  ;;  %746 = vset.pattern.permute.xlu1 %v774_v4  ;;  %v33_v5 = vld [vmem:[%s877_s2 + $0x8] sm:$0xff]  ;;  %745 = vset.pattern.permute.xlu0 %v774_v4  ;;  %v30_v10 = vld [vmem:[%s876_s1 + $0x10] sm:$0xff] }
   0x2   :  { %v28_v1 = vld [vmem:[%s876_s1] sm:$0xff]  ;;  %v71_v2 = vsel %vm69_vm0, %v27_v0, 0  ;;  %v29_v6 = vld [vmem:[%s876_s1 + $0x8] sm:$0xff]  ;;  %43 = vperm.xlu1 %746, %v33_v5   ;;  %v35_v11 = vld [vmem:[%s877_s2 + $0x18] sm:$0xff]  ;;  %747 = vset.pattern.permute.xlu2 %v774_v4 }
   0x3   :  { %v58_v3 = vsel %vm56_vm1, %v28_v1, 0  ;;  %v88_v7 = vand.u32 4294901760, %v71_v2  ;;  %v61_v9 = vsel %vm56_vm1, %v29_v6, 0  ;;  %53 = vperm.xlu0 %745, %v35_v11  }
   0x4   :  { %v90_v8 = vand.u32 4294901760, %v58_v3  ;;  %v98_v12 = vand.u32 4294901760, %v61_v9 }
   0x5   :  { %12 = vsyncpa [#allocation3], 0  ;;  %v139_v13 = vsub.f32 %v71_v2, %v88_v7  ;;  %89 = vmatpush.msra.mxu0 %v88_v7  ;;  %216 = vmatpush.msra.mxu3 %v88_v7  ;;  %v64_v16 = vsel %vm56_vm1, %v30_v10, 0  ;;  %v32_v19 = vld [vmem:[%s877_s2] sm:$0xff]  ;;  %v34_v24 = vld [vmem:[%s877_s2 + $0x10] sm:$0xff]  ;;  %vm330_vm2 = vcmask 261120  }
   0x6   :  { %v91_v14 = vsub.f32 %v58_v3, %v90_v8  ;;  %v99_v15 = vsub.f32 %v61_v9, %v98_v12  ;;  %v106_v23 = vand.u32 4294901760, %v64_v16  ;;  %v31_v27 = vld [vmem:[%s876_s1 + $0x18] sm:$0xff]  ;;  %v556_v40 = vld [vmem:[%s881_s6] sm:$0xff]  ;;  %vm562_vm3 = vcmask 130048   ;;  %s734_s28 = sshll.u32 %s882_s7, 4  ;;  %s735_s28 = int_to_ptr.hbm [resolvable:$true] %s734_s28 }
   0x7   :  { %178 = vmatpush.msra.mxu2 %v139_v13  ;;  %v140_v18 = vand.u32 4294901760, %v139_v13  ;;  %v67_v30 = vsel %vm56_vm1, %v31_v27, 0  ;;  %vm725_vm4 = vcmask 64512  }
   0x8   :  { %v92_v17 = vand.u32 4294901760, %v91_v14  ;;  %181 = vmatmul.f32.vlgmr.msra.gmra.mxu2 %v91_v14  ;;  %v100_v22 = vand.u32 4294901760, %v99_v15  ;;  %v107_v29 = vsub.f32 %v64_v16, %v106_v23  ;;  %v114_v33 = vand.u32 4294901760, %v67_v30 }
   0x9   :  { %v141_v21 = vsub.f32 %v139_v13, %v140_v18  ;;  %260 = vmatpush.msrb.mxu0 %v140_v18 }
   0xa   :  { %v93_v20 = vsub.f32 %v91_v14, %v92_v17  ;;  %220 = vmatmul.f32.vlgmr.msra.gmra.mxu3 %v92_v17  ;;  %38 = vperm.xlu1 %746, %v32_v19   ;;  %v101_v28 = vsub.f32 %v99_v15, %v100_v22  ;;  %v108_v32 = vand.u32 4294901760, %v107_v29  ;;  %v115_v35 = vsub.f32 %v67_v30, %v114_v33  ;;  %v316_v19 = vld [vmem:[%s878_s3] sm:$0xff] }
   0xb   :  { %v142_v26 = vand.u32 4294901760, %v141_v21  ;;  %48 = vperm.xlu0 %745, %v34_v24  }
   0xc   :  { %v94_v25 = vand.u32 4294901760, %v93_v20  ;;  %v102_v31 = vand.u32 4294901760, %v101_v28  ;;  %v109_v34 = vsub.f32 %v107_v29, %v108_v32  ;;  %v116_v37 = vand.u32 4294901760, %v115_v35 }
   0xd   :  { %143 = vmatpush.msra.mxu1 %v142_v26  ;;  %v332_v26 = vsel %vm330_vm2, %v316_v19, 0 }
   0xe   :  { %95 = vmatmul.f32.vlgmr.msra.gmra.mxu0 %v94_v25  ;;  %145 = vmatmul.f32.vlgmr.msra.gmra.mxu1 %v90_v8  ;;  %v110_v36 = vand.u32 4294901760, %v109_v34  ;;  %v117_v38 = vsub.f32 %v115_v35, %v116_v37  ;;  %v357_v30 = vand.u32 4294901760, %v332_v26 }
   0xf   :  { %294 = vmatpush.msrb.mxu1 %v88_v7 }
  0x10   :  { %186 = vmatmul.f32.gmra.mxu2 %v99_v15  ;;  %v118_v39 = vand.u32 4294901760, %v117_v38  ;;  %v857_v38 = vsub.f32 %v332_v26, %v357_v30 }
  0x12   :  { %226 = vmatmul.f32.gmra.mxu3 %v100_v22 }
  0x13   :  { %559 = vperm.xlu0 %745, %v556_v40  }
  0x16   :  { %103 = vmatmul.f32.gmra.mxu0 %v102_v31  ;;  %149 = vmatmul.f32.gmra.mxu1 %v98_v12 }
  0x18   :  { %191 = vmatmul.f32.gmra.mxu2 %v107_v29 }
  0x1a   :  { %232 = vmatmul.f32.gmra.mxu3 %v108_v32 }
  0x1e   :  { %111 = vmatmul.f32.gmra.mxu0 %v110_v36  ;;  %153 = vmatmul.f32.gmra.mxu1 %v106_v23 }
  0x20   :  { %196 = vmatmul.f32.gmra.mxu2 %v115_v35 }
  0x22   :  { %238 = vmatmul.f32.gmra.mxu3 %v116_v37  ;;  %v317_v37 = vld [vmem:[%s878_s3 + $0x8] sm:$0xff] }
  0x26   :  { %119 = vmatmul.f32.gmra.mxu0 %v118_v39  ;;  %157 = vmatmul.f32.gmra.mxu1 %v114_v33 }
  0x2e   :  { %262 = vmatmul.f32.vlgmr.msrb.gmra.mxu0 %v90_v8  ;;  %296 = vmatmul.f32.vlgmr.msrb.gmra.mxu1 %v90_v8 }
  0x36   :  { %266 = vmatmul.f32.gmra.mxu0 %v98_v12  ;;  %300 = vmatmul.f32.gmra.mxu1 %v98_v12 }
  0x3e   :  { %270 = vmatmul.f32.gmra.mxu0 %v106_v23  ;;  %304 = vmatmul.f32.gmra.mxu1 %v106_v23 }
  0x46   :  { %274 = vmatmul.f32.gmra.mxu0 %v114_v33  ;;  %308 = vmatmul.f32.gmra.mxu1 %v114_v33 }
  0x74   :  { %v44_v48 = vpop.permute.xlu1 %43 }
  0x75   :  { %v54_v49 = vpop.permute.xlu0 %53 }
  0x7c   :  { %v39_v54 = vpop.permute.xlu1 %38 }
  0x7d   :  { %v49_v55 = vpop.permute.xlu0 %48 }
  0x8b   :  { %v96_v41 = vpop.f32.mrf.mxu0  ;;  %v146_v42 = vpop.f32.mrf.mxu1 }
  0x8c   :  { %v182_v47 = vpop.f32.mrf.mxu2  ;;  %v97_v60 = vadd.f32 %v96_v41, %v39_v54 }
  0x8d   :  { %v221_v50 = vpop.f32.mrf.mxu3 }
  0x8e   :  { %v147_v0 = vadd.f32 %v146_v42, %v97_v60  ;;  %v335_v42 = vsel %vm330_vm2, %v317_v37, 0 }
  0x90   :  { %v183_v6 = vadd.f32 %v182_v47, %v147_v0  ;;  %v319_v0 = vld [vmem:[%s879_s4 + $0x8] sm:$0xff] }
  0x91   :  { %327 = vperm.xlu2 %747, %v319_v0  }
  0x92   :  { %v222_v10 = vadd.f32 %v221_v50, %v183_v6 }
  0x93   :  { %v104_v43 = vpop.f32.mrf.mxu0  ;;  %v150_v44 = vpop.f32.mrf.mxu1 }
  0x94   :  { %v187_v53 = vpop.f32.mrf.mxu2  ;;  %v105_v58 = vadd.f32 %v104_v43, %v44_v48 }
  0x95   :  { %v227_v56 = vpop.f32.mrf.mxu3 }
  0x96   :  { %v151_v62 = vadd.f32 %v150_v44, %v105_v58 }
  0x98   :  { %v188_v3 = vadd.f32 %v187_v53, %v151_v62 }
  0x9a   :  { %v228_v9 = vadd.f32 %v227_v56, %v188_v3 }
  0x9b   :  { %v112_v45 = vpop.f32.mrf.mxu0  ;;  %v154_v46 = vpop.f32.mrf.mxu1 }
  0x9c   :  { %v113_v61 = vadd.f32 %v112_v45, %v49_v55  ;;  %v192_v63 = vpop.f32.mrf.mxu2  ;;  %v359_v45 = vand.u32 4294901760, %v857_v38 }
  0x9d   :  { %v233_v5 = vpop.f32.mrf.mxu3 }
  0x9e   :  { %v155_v1 = vadd.f32 %v154_v46, %v113_v61 }
  0xa0   :  { %v193_v7 = vadd.f32 %v192_v63, %v155_v1 }
  0xa2   :  { %v234_v11 = vadd.f32 %v233_v5, %v193_v7 }
  0xa3   :  { %v120_v51 = vpop.f32.mrf.mxu0  ;;  %v158_v52 = vpop.f32.mrf.mxu1 }
  0xa4   :  { %v121_v8 = vadd.f32 %v120_v51, %v54_v49  ;;  %v197_v14 = vpop.f32.mrf.mxu2  ;;  %v365_v49 = vand.u32 4294901760, %v335_v42 }
  0xa5   :  { %v239_v23 = vpop.f32.mrf.mxu3 }
  0xa6   :  { %v159_v12 = vadd.f32 %v158_v52, %v121_v8  ;;  %v360_v52 = vsub.f32 %v857_v38, %v359_v45  ;;  %v366_v56 = vsub.f32 %v335_v42, %v365_v49 }
  0xa8   :  { %v198_v20 = vadd.f32 %v197_v14, %v159_v12  ;;  %v361_v60 = vand.u32 4294901760, %v360_v52  ;;  %v367_v62 = vand.u32 4294901760, %v366_v56  ;;  %v555_v12 = vld [vmem:[%s880_s5] sm:$0xff]  ;;  %s775_s5 = smov [#allocation2]  }
  0xa9   :  { %s732_s25 = sshll.u32 %s775_s5, 4  ;;  %s733_s25 = int_to_ptr.vmem [resolvable:$true] %s732_s25 }
  0xaa   :  { %v240_v27 = vadd.f32 %v239_v23, %v198_v20 }
  0xab   :  { %v263_v57 = vpop.f32.mrf.mxu0  ;;  %v297_v59 = vpop.f32.mrf.mxu1 }
  0xac   :  { %v264_v16 = vadd.f32 %v263_v57, %v222_v10 }
  0xae   :  { %v298_v24 = vadd.f32 %v297_v59, %v264_v16 }
  0xb0   :  { %v312_v31 = vmax.f32 %v298_v24, 0.0 }
  0xb2   :  { %v355_v39 = vand.u32 4294901760, %v312_v31 }
  0xb3   :  { %v267_v2 = vpop.f32.mrf.mxu0  ;;  %v301_v4 = vpop.f32.mrf.mxu1 }
  0xb4   :  { %v268_v13 = vadd.f32 %v267_v2, %v228_v9  ;;  %v405_v46 = vsub.f32 %v312_v31, %v355_v39  ;;  %v368_v2 = vsub.f32 %v366_v56, %v367_v62 }
  0xb6   :  { %v302_v21 = vadd.f32 %v301_v4, %v268_v13  ;;  %v406_v55 = vand.u32 4294901760, %v405_v46  ;;  %v369_v3 = vand.u32 4294901760, %v368_v2  ;;  %v318_v4 = vld [vmem:[%s879_s4] sm:$0xff] }
  0xb7   :  { %322 = vperm.xlu2 %747, %v318_v4  }
  0xb8   :  { %v313_v28 = vmax.f32 %v302_v21, 0.0  ;;  %v407_v61 = vsub.f32 %v405_v46, %v406_v55 }
  0xba   :  { %v353_v35 = vand.u32 4294901760, %v313_v28  ;;  %v408_v1 = vand.u32 4294901760, %v407_v61 }
  0xbb   :  { %v271_v15 = vpop.f32.mrf.mxu0  ;;  %v305_v18 = vpop.f32.mrf.mxu1 }
  0xbc   :  { %v272_v17 = vadd.f32 %v271_v15, %v234_v11  ;;  %v399_v43 = vsub.f32 %v313_v28, %v353_v35 }
  0xbe   :  { %v306_v22 = vadd.f32 %v305_v18, %v272_v17  ;;  %v400_v51 = vand.u32 4294901760, %v399_v43  ;;  %v564_v17 = vsel %vm562_vm3, %v555_v12, 0 }
  0xc0   :  { %v314_v25 = vmax.f32 %v306_v22, 0.0  ;;  %v401_v58 = vsub.f32 %v399_v43, %v400_v51  ;;  %v584_v22 = vand.u32 4294901760, %v564_v17 }
  0xc2   :  { %v351_v32 = vand.u32 4294901760, %v314_v25  ;;  %v402_v63 = vand.u32 4294901760, %v401_v58 }
  0xc3   :  { %v275_v29 = vpop.f32.mrf.mxu0  ;;  %v309_v34 = vpop.f32.mrf.mxu1 }
  0xc4   :  { %v276_v33 = vadd.f32 %v275_v29, %v240_v27  ;;  %v393_v40 = vsub.f32 %v314_v25, %v351_v32  ;;  %v585_v27 = vsub.f32 %v564_v17, %v584_v22 }
  0xc6   :  { %v310_v36 = vadd.f32 %v309_v34, %v276_v33  ;;  %v394_v48 = vand.u32 4294901760, %v393_v40  ;;  %v586_v34 = vand.u32 4294901760, %v585_v27 }
  0xc8   :  { %v315_v41 = vmax.f32 %v310_v36, 0.0  ;;  %v395_v54 = vsub.f32 %v393_v40, %v394_v48 }
  0xca   :  { %v349_v44 = vand.u32 4294901760, %v315_v41  ;;  %v396_v59 = vand.u32 4294901760, %v395_v54 }
  0xcc   :  { %v387_v47 = vsub.f32 %v315_v41, %v349_v44  ;;  %350 = vmatpush.msrb.mxu2 %v349_v44  ;;  %537 = vmatpush.msra.mxu1 %v349_v44 }
  0xce   :  { %352 = vmatpush.msrb.mxu2 %v351_v32  ;;  %539 = vmatpush.msra.mxu1 %v351_v32  ;;  %v388_v50 = vand.u32 4294901760, %v387_v47 }
  0xd0   :  { %354 = vmatpush.msrb.mxu2 %v353_v35  ;;  %502 = vmatpush.msra.mxu0 %v388_v50  ;;  %v389_v53 = vsub.f32 %v387_v47, %v388_v50 }
  0xd1   :  { %541 = vmatpush.msra.mxu1 %v353_v35 }
  0xd2   :  { %356 = vmatpush.msrb.mxu2 %v355_v39  ;;  %506 = vmatpush.msra.mxu0 %v394_v48  ;;  %v390_v57 = vand.u32 4294901760, %v389_v53 }
  0xd3   :  { %543 = vmatpush.msra.mxu1 %v355_v39  ;;  %362 = vmatmul.f32.vlgmr.msrb.gmra.mxu2 %v361_v60 }
  0xd4   :  { %433 = vmatpush.msra.mxu2 %v387_v47  ;;  %391 = vmatpush.msrb.mxu3 %v390_v57 }
  0xd5   :  { %510 = vmatpush.msra.mxu0 %v400_v51  ;;  %545 = vmatmul.f32.vlgmr.msra.gmra.mxu1 %v357_v30  ;;  %v560_v51 = vpop.permute.xlu0 %559 }
  0xd6   :  { %436 = vmatpush.msra.mxu2 %v393_v40  ;;  %397 = vmatpush.msrb.mxu3 %v396_v59 }
  0xd7   :  { %514 = vmatpush.msra.mxu0 %v406_v55 }
  0xd8   :  { %439 = vmatpush.msra.mxu2 %v399_v43  ;;  %516 = vmatmul.f32.vlgmr.msra.gmra.mxu0 %v357_v30 }
  0xd9   :  { %403 = vmatpush.msrb.mxu3 %v402_v63 }
  0xda   :  { %442 = vmatpush.msra.mxu2 %v405_v46 }
  0xdb   :  { %409 = vmatpush.msrb.mxu3 %v408_v1  ;;  %370 = vmatmul.f32.gmra.mxu2 %v369_v3 }
  0xdc   :  { %411 = vmatmul.f32.vlgmr.msrb.gmra.mxu3 %v357_v30 }
  0xdd   :  { %467 = vmatpush.msra.mxu3 %v349_v44  ;;  %549 = vmatmul.f32.gmra.mxu1 %v365_v49 }
  0xdf   :  { %469 = vmatpush.msra.mxu3 %v351_v32 }
  0xe0   :  { %520 = vmatmul.f32.gmra.mxu0 %v365_v49 }
  0xe1   :  { %471 = vmatpush.msra.mxu3 %v353_v35 }
  0xe3   :  { %473 = vmatpush.msra.mxu3 %v355_v39  ;;  %445 = vmatmul.f32.vlgmr.msra.gmra.mxu2 %v857_v38  ;;  %v587_v38 = vsub.f32 %v585_v27, %v586_v34 }
  0xe4   :  { %415 = vmatmul.f32.gmra.mxu3 %v365_v49 }
  0xe5   :  { %v588_v42 = vand.u32 4294901760, %v587_v38 }
  0xeb   :  { %450 = vmatmul.f32.gmra.mxu2 %v366_v56  ;;  %v328_v5 = vpop.permute.xlu2 %327 }
  0xec   :  { %477 = vmatmul.f32.vlgmr.msra.gmra.mxu3 %v359_v45 }
  0xf4   :  { %483 = vmatmul.f32.gmra.mxu3 %v367_v62 }
 0x111   :  { %v323_v9 = vpop.permute.xlu2 %322 }
 0x152   :  { %v546_v19 = vpop.f32.mrf.mxu1 }
 0x155   :  { %v517_v15 = vpop.f32.mrf.mxu0 }
 0x156   :  { %v363_v6 = vpop.f32.mrf.mxu2 }
 0x157   :  { %v364_v11 = vadd.f32 %v363_v6, %v323_v9 }
 0x15a   :  { %v550_v33 = vpop.f32.mrf.mxu1 }
 0x15d   :  { %v521_v31 = vpop.f32.mrf.mxu0 }
 0x15e   :  { %v371_v8 = vpop.f32.mrf.mxu2 }
 0x15f   :  { %v412_v7 = vpop.f32.mrf.mxu3  ;;  %v372_v20 = vadd.f32 %v371_v8, %v328_v5 }
 0x160   :  { %v413_v13 = vadd.f32 %v412_v7, %v364_v11 }
 0x166   :  { %v446_v14 = vpop.f32.mrf.mxu2 }
 0x167   :  { %v416_v10 = vpop.f32.mrf.mxu3  ;;  %v447_v16 = vadd.f32 %v446_v14, %v413_v13 }
 0x168   :  { %v417_v24 = vadd.f32 %v416_v10, %v372_v20 }
 0x16e   :  { %v451_v26 = vpop.f32.mrf.mxu2 }
 0x16f   :  { %v478_v18 = vpop.f32.mrf.mxu3  ;;  %v452_v29 = vadd.f32 %v451_v26, %v417_v24 }
 0x170   :  { %v479_v21 = vadd.f32 %v478_v18, %v447_v16 }
 0x172   :  { %v518_v23 = vadd.f32 %v517_v15, %v479_v21 }
 0x174   :  { %v547_v25 = vadd.f32 %v546_v19, %v518_v23 }
 0x176   :  { %v553_v28 = vmax.f32 %v547_v25, 0.0 }
 0x177   :  { %v484_v30 = vpop.f32.mrf.mxu3 }
 0x178   :  { %v485_v32 = vadd.f32 %v484_v30, %v452_v29  ;;  %v582_v35 = vand.u32 4294901760, %v553_v28 }
 0x17a   :  { %v522_v36 = vadd.f32 %v521_v31, %v485_v32  ;;  %v614_v39 = vsub.f32 %v553_v28, %v582_v35 }
 0x17c   :  { %v551_v37 = vadd.f32 %v550_v33, %v522_v36  ;;  %v615_v44 = vand.u32 4294901760, %v614_v39 }
 0x17e   :  { %v554_v40 = vmax.f32 %v551_v37, 0.0  ;;  %v616_v47 = vsub.f32 %v614_v39, %v615_v44 }
 0x180   :  { %v580_v41 = vand.u32 4294901760, %v554_v40  ;;  %v617_v49 = vand.u32 4294901760, %v616_v47 }
 0x182   :  { %v608_v43 = vsub.f32 %v554_v40, %v580_v41  ;;  %581 = vmatpush.msrb.mxu2 %v580_v41  ;;  %717 = vmatpush.msrb.mxu1 %v580_v41 }
 0x184   :  { %v609_v45 = vand.u32 4294901760, %v608_v43  ;;  %583 = vmatpush.msrb.mxu2 %v582_v35  ;;  %719 = vmatpush.msrb.mxu1 %v582_v35 }
 0x185   :  { %589 = vmatmul.f32.vlgmr.msrb.gmra.mxu2 %v588_v42  ;;  %721 = vmatmul.f32.vlgmr.msrb.gmra.mxu1 %v584_v22 }
 0x186   :  { %v610_v46 = vsub.f32 %v608_v43, %v609_v45  ;;  %640 = vmatpush.msra.mxu2 %v608_v43  ;;  %692 = vmatpush.msrb.mxu0 %v609_v45 }
 0x188   :  { %643 = vmatpush.msra.mxu2 %v614_v39  ;;  %696 = vmatpush.msrb.mxu0 %v615_v44  ;;  %v611_v48 = vand.u32 4294901760, %v610_v46 }
 0x189   :  { %698 = vmatmul.f32.vlgmr.msrb.gmra.mxu0 %v584_v22 }
 0x18a   :  { %612 = vmatpush.msrb.mxu3 %v611_v48 }
 0x18c   :  { %618 = vmatpush.msrb.mxu3 %v617_v49 }
 0x18d   :  { %620 = vmatmul.f32.vlgmr.msrb.gmra.mxu3 %v584_v22  ;;  %646 = vmatmul.f32.vlgmr.msra.gmra.mxu2 %v585_v27 }
 0x18e   :  { %665 = vmatpush.msra.mxu3 %v580_v41 }
 0x190   :  { %667 = vmatpush.msra.mxu3 %v582_v35 }
 0x195   :  { %671 = vmatmul.f32.vlgmr.msra.gmra.mxu3 %v586_v34 }
 0x202   :  { %v722_v60 = vpop.f32.mrf.mxu1 }
 0x206   :  { %v699_v58 = vpop.f32.mrf.mxu0 }
 0x208   :  { %v590_v50 = vpop.f32.mrf.mxu2 }
 0x209   :  { %v591_v53 = vadd.f32 %v590_v50, %v560_v51 }
 0x210   :  { %v621_v52 = vpop.f32.mrf.mxu3  ;;  %v647_v55 = vpop.f32.mrf.mxu2 }
 0x211   :  { %v622_v54 = vadd.f32 %v621_v52, %v591_v53 }
 0x213   :  { %v648_v56 = vadd.f32 %v647_v55, %v622_v54 }
 0x218   :  { %v672_v57 = vpop.f32.mrf.mxu3 }
 0x219   :  { %v673_v59 = vadd.f32 %v672_v57, %v648_v56 }
 0x21b   :  { %v700_v61 = vadd.f32 %v699_v58, %v673_v59 }
 0x21d   :  { %v723_v62 = vadd.f32 %v722_v60, %v700_v61 }
 0x21f   :  { %726 = vst.msk [vmem:[#allocation2] sm:$0xff] %vm725_vm4, %v723_v62 }
 0x220   :  { %737 = dma.vmem_to_hbm [thread:$0]  %s733_s25, 128, %s735_s28, [#allocation3]  }
 0x221   :  { %772 = dma.done.wait [#allocation3], 128  }
 0x222   :  { %773 = vsyncadd [#allocation3], 4294967168 }
 0x223   :  { %742 = vsyncpa [#allocation3], 1 }

</bundles_post_ra>
